<compile_context>
chip_gen: v7x
topology: tpu7x:2x2x1
jax: 0.10.0
libtpu: 0.0.40
codegen_flags: <defaults>
</compile_context>

<pallas_src>
import numpy as np
import jax
import jax.numpy as jnp
from jax.experimental import pallas as pl
from jax.experimental.pallas import tpu as pltpu

EPSILON = 1e-6
BN_EPS = 1e-5          # torch.nn.BatchNorm1d default eps

f32 = jnp.float32
bf16 = jnp.bfloat16


# ----------------------------------------------------------------------------
# helpers
# ----------------------------------------------------------------------------
def _round_up(x, m):
    return ((x + m - 1) // m) * m


def _row_spec(tile, cols):
    return pl.BlockSpec((tile, cols), lambda i: (i, 0))


def _const_spec(shape):
    return pl.BlockSpec(shape, lambda i: (0, 0))


_CPARAMS = pltpu.CompilerParams(
    dimension_semantics=("parallel",),
    vmem_limit_bytes=48 * 1024 * 1024,
)


def _cross3(a, b):
    ax, ay, az = a[:, 0:1], a[:, 1:2], a[:, 2:3]
    bx, by, bz = b[:, 0:1], b[:, 1:2], b[:, 2:3]
    return jnp.concatenate(
        [ay * bz - az * by, az * bx - ax * bz, ax * by - ay * bx], axis=1)


# ----------------------------------------------------------------------------
# Pass 1: first Linear of edge_2D_emb (f32) + per-tile BN partial statistics.
# nedge_ref lives in SMEM; rows >= nedge are padding and excluded from stats.
# ----------------------------------------------------------------------------
def edge_linear1_kernel(nedge_ref, xcat_ref, w1_ref, b1_ref, h1_ref, stats_ref):
    h1 = jnp.dot(xcat_ref[...], w1_ref[...], preferred_element_type=f32) + b1_ref[...]
    h1_ref[...] = h1

    te, d = h1.shape
    base = pl.program_id(0) * te
    idx = base + jax.lax.broadcasted_iota(jnp.int32, (te, 1), 0)
    mask = (idx < nedge_ref[0]).astype(f32)
    hm = h1 * mask
    s = jnp.sum(hm, axis=0, keepdims=True)           # [1, D]  masked sum
    ss = jnp.sum(hm * h1, axis=0, keepdims=True)     # [1, D]  masked sum of squares
    stats_ref[...] = jnp.concatenate([s, ss, jnp.zeros((6, d), f32)], axis=0)


# ----------------------------------------------------------------------------
# Main per-edge kernel: hoisted BN affine -> ReLU -> Linear, coord2basis,
# Fourier features with coff_mlp folded into project layer 1, project MLP.
# Outputs bf16 edge_attr + f32 packed equivariant basis.
# ----------------------------------------------------------------------------
def edge_feature_kernel(h1_ref, scale_ref, shift_ref, pos_ref,
                        e2d_w2_ref, e2d_b2_ref, four_w_ref,
                        pj_wsin_ref, pj_wcos_ref, pj_wi_ref, pj_wj_ref, pj_b1_ref,
                        pj_w2_ref, pj_b2_ref,
                        edge_attr_ref, basis_ref):
    # edge_2D_emb tail: BN (hoisted scale/shift) -> ReLU -> Linear(D->H)
    hb = jnp.maximum(h1_ref[...] * scale_ref[...] + shift_ref[...], 0.0)
    edge2d = jnp.dot(hb.astype(bf16), e2d_w2_ref[...],
                     preferred_element_type=f32) + e2d_b2_ref[...]

    # coord2basis on perturbed positions (f32 geometric math, packed [TE,8] slab)
    pos = pos_ref[...]
    pr = pos[:, 0:3]
    pc = pos[:, 4:7]
    diff = pr - pc
    radial = jnp.sum(diff * diff, axis=1, keepdims=True)
    cross = _cross3(pr, pc)
    inv_norm = pl.reciprocal(jnp.sqrt(radial) + EPSILON, approx=True)
    diff = diff * inv_norm
    inv_cnorm = pl.reciprocal(
        jnp.sqrt(jnp.sum(cross * cross, axis=1, keepdims=True)) + EPSILON,
        approx=True)
    cross = cross * inv_cnorm
    vert = _cross3(diff, cross)

    # local-frame coefficients (|.| on the cross component)
    ci0 = jnp.sum(diff * pr, axis=1, keepdims=True)
    ci1 = jnp.abs(jnp.sum(cross * pr, axis=1, keepdims=True))
    ci2 = jnp.sum(vert * pr, axis=1, keepdims=True)
    cj0 = jnp.sum(diff * pc, axis=1, keepdims=True)
    cj1 = jnp.abs(jnp.sum(cross * pc, axis=1, keepdims=True))
    cj2 = jnp.sum(vert * pc, axis=1, keepdims=True)

    dotp = ci0 * cj0 + ci1 * cj1 + ci2 * cj2
    ni = jnp.sqrt(ci0 * ci0 + ci1 * ci1 + ci2 * ci2)
    nj = jnp.sqrt(cj0 * cj0 + cj1 * cj1 + cj2 * cj2)
    pcos = dotp * pl.reciprocal((ni + EPSILON) * (nj + EPSILON), approx=True)
    pcos = jnp.clip(pcos, -1.0, 1.0)
    psin = jnp.sqrt(jnp.maximum(1.0 - pcos * pcos, 0.0))

    # Gaussian-Fourier features of coeff columns 0 & 2; coff_mlp is folded into
    # the project first-layer weights (pj_wi / pj_wj), removing concats+matmul.
    fw = four_w_ref[...]                       # [1, H] f32
    two_pi = np.float32(2.0 * np.pi)

    def _feats(c0, c2):
        p0 = c0 * fw * two_pi
        p2 = c2 * fw * two_pi
        return jnp.concatenate(
            [jnp.sin(p0), jnp.cos(p0), jnp.sin(p2), jnp.cos(p2)],
            axis=1).astype(bf16)               # [TE, 4H]

    fi = _feats(ci0, ci2)
    fj = _feats(cj0, cj2)

    p = (psin * pj_wsin_ref[...] + pcos * pj_wcos_ref[...]
         + jnp.dot(fi, pj_wi_ref[...], preferred_element_type=f32)
         + jnp.dot(fj, pj_wj_ref[...], preferred_element_type=f32)
         + pj_b1_ref[...])
    p = jax.nn.silu(p)
    p = jnp.dot(p.astype(bf16), pj_w2_ref[...],
                preferred_element_type=f32) + pj_b2_ref[...]

    edge_attr_ref[...] = (edge2d + p).astype(edge_attr_ref.dtype)
    te = diff.shape[0]
    basis_ref[...] = jnp.concatenate(
        [diff, cross, vert, jnp.zeros((te, 7), f32)], axis=1)


# ----------------------------------------------------------------------------
# node_emb: single Linear (MLP with one layer -> no trailing activation)
# ----------------------------------------------------------------------------
def node_linear_kernel(x_ref, w_ref, b_ref, out_ref):
    res = jnp.dot(x_ref[...], w_ref[...], preferred_element_type=f32) + b_ref[...]
    out_ref[...] = res.astype(out_ref.dtype)


# ----------------------------------------------------------------------------
# One message-passing node update: z = h + agg; Linear(H->2H); SiLU; Linear(2H->H)
# ----------------------------------------------------------------------------
def conv_update_kernel(h_ref, agg_ref, w1_ref, b1_ref, w2_ref, b2_ref, out_ref):
    z = h_ref[...].astype(f32) + agg_ref[...]
    z = jnp.dot(z.astype(bf16), w1_ref[...], preferred_element_type=f32) + b1_ref[...]
    z = jax.nn.silu(z)
    z = jnp.dot(z.astype(bf16), w2_ref[...], preferred_element_type=f32) + b2_ref[...]
    out_ref[...] = z.astype(out_ref.dtype)


# ----------------------------------------------------------------------------
# Dynamic coefficient MLP + basis mixing (per edge); split first-layer weight
# avoids the lane concat of [h_row+h_col | edge_attr].
# ----------------------------------------------------------------------------
def dyn_mix_kernel(h_row_ref, h_col_ref, ea_ref, basis_ref,
                   w1a_ref, w1b_ref, b1_ref, w2_ref, b2_ref, mix_ref):
    hsum = (h_row_ref[...].astype(f32) + h_col_ref[...].astype(f32)).astype(bf16)
    f = (jnp.dot(hsum, w1a_ref[...], preferred_element_type=f32)
         + jnp.dot(ea_ref[...], w1b_ref[...], preferred_element_type=f32)
         + b1_ref[...])                                          # [TE, HC]
    f = jax.nn.silu(f)
    coff = jnp.dot(f.astype(bf16), w2_ref[...],
                   preferred_element_type=f32) + b2_ref[...]     # [TE, 3]
    b = basis_ref[...]
    mix_ref[...] = (coff[:, 0:1] * b[:, 0:3]
                    + coff[:, 1:2] * b[:, 3:6]
                    + coff[:, 2:3] * b[:, 6:9])


# ----------------------------------------------------------------------------
# Parameter init (deterministic, synthetic)
# ----------------------------------------------------------------------------
def init_params(key, emb_dim, hidden_dim, hidden_coff_dim=128, num_convs=2):
    D, H, HC = emb_dim, hidden_dim, hidden_coff_dim
    ks = jax.random.split(key, 24)
    g = lambda k, s, sc=0.05: (sc * jax.random.normal(k, s)).astype(f32)
    p = {}
    # node_emb: MLP(D, [H]) -> single Linear
    p["node_w"] = g(ks[0], (D, H)); p["node_b"] = g(ks[1], (1, H))
    # edge_2D_emb: Linear(2D,D) -> BN(D) -> ReLU -> Linear(D,H)
    p["e2d_w1"] = g(ks[2], (2 * D, D)); p["e2d_b1"] = g(ks[3], (1, D))
    p["bn_g"] = jnp.ones((1, D), f32); p["bn_b"] = jnp.zeros((1, D), f32)
    p["e2d_w2"] = g(ks[4], (D, H)); p["e2d_b2"] = g(ks[5], (1, H))
    # GaussianFourierProjection(embedding_size=H, scale=1): W ~ N(0,1)
    p["four_w"] = jax.random.normal(ks[6], (1, H)).astype(f32)
    # coff_mlp: Linear(4H, H)
    p["coff_w"] = g(ks[7], (4 * H, H)); p["coff_b"] = g(ks[8], (1, H))
    # project: MLP(2H+2, [H, H]); first-layer weight split: sin/cos cols + [2H,H]
    p["pj_wsin"] = g(ks[9], (1, H)); p["pj_wcos"] = g(ks[10], (1, H))
    p["pj_wij"] = g(ks[11], (2 * H, H)); p["pj_b1"] = g(ks[12], (1, H))
    p["pj_w2"] = g(ks[13], (H, H)); p["pj_b2"] = g(ks[14], (1, H))
    # score network conv layers
    p["conv_w1"] = g(ks[15], (num_convs, H, 2 * H))
    p["conv_b1"] = g(ks[16], (num_convs, 1, 2 * H))
    p["conv_w2"] = g(ks[17], (num_convs, 2 * H, H))
    p["conv_b2"] = g(ks[18], (num_convs, 1, H))
    # dynamic coefficient MLP: (2H) -> HC -> 3
    p["dyn_w1"] = g(ks[19], (2 * H, HC)); p["dyn_b1"] = jnp.zeros((1, HC), f32)
    p["dyn_w2"] = g(ks[20], (HC, 3)); p["dyn_b2"] = jnp.zeros((1, 3), f32)
    return p


# ----------------------------------------------------------------------------
# Forward (glue = gathers / sorted segment_sum / tiny reductions; compute = Pallas)
# ----------------------------------------------------------------------------
def sde_model_2d_to_3d_forward(params, node_2D_repr, positions, edge_index,
                               node2graph, num_graphs, key, *,
                               num_diffusion_timesteps=1000,
                               sigma_min=0.1, sigma_max=1.0,
                               anneal_power=2.0,
                               edge_tile=2048, node_tile=1024):
    N, D = node_2D_repr.shape
    H = params["node_w"].shape[1]
    HC = params["dyn_w1"].shape[1]
    G = int(num_graphs)

    row = edge_index[0].astype(jnp.int32)
    col = edge_index[1].astype(jnp.int32)
    E = int(row.shape[0])

    # sort edges by destination once -> sorted segmented reductions downstream
    perm = jnp.argsort(row)
    row = row[perm]
    col = col[perm]

    # ---- diffusion-time sampling + VESDE perturbation (same semantics as ref)
    k_noise, k_time = jax.random.split(key)
    pos_noise = jax.random.normal(k_noise, positions.shape).astype(f32)
    half = G // 2 + 1
    ts = jax.random.randint(k_time, (half,), 0, num_diffusion_timesteps)
    ts = jnp.concatenate([ts, num_diffusion_timesteps - ts - 1])[:G]
    ts = ts.astype(f32) / num_diffusion_timesteps * (1.0 - EPSILON) + EPSILON
    t_pos = ts[node2graph]                                        # [N]
    std_pos = sigma_min * (sigma_max / sigma_min) ** t_pos        # [N]
    pos_perturbed = positions.astype(f32) + std_pos[:, None] * pos_noise

    # ---- tiling / padding (tiles multiple of 16 for bf16 sublane packing).
    # N_pad always keeps at least one spare dummy node so padded edges never
    # touch real nodes (drops the edge-mask multiply in the conv message path).
    TE = min(edge_tile, _round_up(E, 16))
    E_pad = _round_up(E, TE)
    TN = min(node_tile, _round_up(N + 1, 16))
    N_pad = _round_up(N + 1, TN)
    dummy = N_pad - 1
    n_et = E_pad // TE
    n_nt = N_pad // TN

    row_g = jnp.concatenate([row, jnp.full((E_pad - E,), dummy, jnp.int32)])
    col_g = jnp.concatenate([col, jnp.full((E_pad - E,), dummy, jnp.int32)])

    x_pad = jnp.zeros((N_pad, D), f32).at[:N].set(node_2D_repr.astype(f32))
    pos_pad = jnp.zeros((N_pad, 3), f32).at[:N].set(pos_perturbed)

    # index-driven gathers in glue (no one-hot incidence matrices)
    xcat = jnp.concatenate([x_pad[row_g], x_pad[col_g]], axis=1)       # f32 [E_pad,2D]
    pos_slab = jnp.zeros((E_pad, 8), f32)
    pos_slab = pos_slab.at[:, 0:3].set(pos_pad[row_g]).at[:, 4:7].set(pos_pad[col_g])
    nedge = jnp.array([E], jnp.int32)

    # ---- pass 1: first Linear of edge_2D_emb (f32) + per-tile BN partial stats
    h1, stats = pl.pallas_call(
        edge_linear1_kernel,
        out_shape=(jax.ShapeDtypeStruct((E_pad, D), f32),
                   jax.ShapeDtypeStruct((n_et * 8, D), f32)),
        grid=(n_et,),
        in_specs=[pl.BlockSpec(memory_space=pltpu.MemorySpace.SMEM),
                  _row_spec(TE, 2 * D),
                  _const_spec((2 * D, D)),
                  _const_spec((1, D))],
        out_specs=(_row_spec(TE, D),
                   pl.BlockSpec((8, D), lambda i: (i, 0))),
        compiler_params=_CPARAMS,
    )(nedge, xcat, params["e2d_w1"], params["e2d_b1"])

    # hoisted BatchNorm batch statistics (train-mode, biased var) from partials
    st = stats.reshape(n_et, 8, D)
    s1 = jnp.sum(st[:, 0, :], axis=0)
    s2 = jnp.sum(st[:, 1, :], axis=0)
    e_f = float(E)
    mu = (s1 / e_f)[None, :]
    var = jnp.maximum(s2 / e_f - mu[0] ** 2, 0.0)[None, :]
    bn_scale = params["bn_g"] * jax.lax.rsqrt(var + BN_EPS)
    bn_shift = params["bn_b"] - mu * bn_scale

    # fold coff_mlp into project's first layer (done once, in f32, in glue)
    wij = params["pj_wij"]                                   # [2H, H]
    pj_wi = (params["coff_w"] @ wij[:H]).astype(bf16)        # [4H, H]
    pj_wj = (params["coff_w"] @ wij[H:]).astype(bf16)        # [4H, H]
    pj_b1 = (params["coff_b"] @ wij[:H] + params["coff_b"] @ wij[H:]
             + params["pj_b1"])                              # [1, H]

    # ---- main per-edge kernel
    edge_attr, basis = pl.pallas_call(
        edge_feature_kernel,
        out_shape=(jax.ShapeDtypeStruct((E_pad, H), bf16),
                   jax.ShapeDtypeStruct((E_pad, 16), f32)),
        grid=(n_et,),
        in_specs=[_row_spec(TE, D), _const_spec((1, D)), _const_spec((1, D)),
                  _row_spec(TE, 8),
                  _const_spec((D, H)), _const_spec((1, H)),
                  _const_spec((1, H)),
                  _const_spec((1, H)), _const_spec((1, H)),
                  _const_spec((4 * H, H)), _const_spec((4 * H, H)),
                  _const_spec((1, H)),
                  _const_spec((H, H)), _const_spec((1, H))],
        out_specs=(_row_spec(TE, H), _row_spec(TE, 16)),
        compiler_params=_CPARAMS,
    )(h1, bn_scale, bn_shift, pos_slab,
      params["e2d_w2"].astype(bf16), params["e2d_b2"],
      params["four_w"],
      params["pj_wsin"], params["pj_wcos"], pj_wi, pj_wj, pj_b1,
      params["pj_w2"].astype(bf16), params["pj_b2"])

    # ---- node_emb (tiled over nodes, bf16 storage for h)
    h = pl.pallas_call(
        node_linear_kernel,
        out_shape=jax.ShapeDtypeStruct((N_pad, H), bf16),
        grid=(n_nt,),
        in_specs=[_row_spec(TN, D), _const_spec((D, H)), _const_spec((1, H))],
        out_specs=_row_spec(TN, H),
        compiler_params=_CPARAMS,
    )(x_pad.astype(bf16), params["node_w"].astype(bf16), params["node_b"])

    # ---- score-network message passing: gather + fused silu + sorted
    #      segment_sum in glue; node MLP in a tiled Pallas kernel per layer.
    num_convs = params["conv_w1"].shape[0]
    for layer in range(num_convs):
        # gather+add+silu fuse into one XLA op producing the f32 messages;
        # padded edges only pollute the dummy node (never read back).
        msg = jax.nn.silu(h[col_g].astype(f32) + edge_attr.astype(f32))
        agg = jax.ops.segment_sum(msg, row_g, num_segments=N_pad,
                                  indices_are_sorted=True)
        h = pl.pallas_call(
            conv_update_kernel,
            out_shape=jax.ShapeDtypeStruct((N_pad, H), bf16),
            grid=(n_nt,),
            in_specs=[_row_spec(TN, H), _row_spec(TN, H),
                      _const_spec((H, 2 * H)), _const_spec((1, 2 * H)),
                      _const_spec((2 * H, H)), _const_spec((1, H))],
            out_specs=_row_spec(TN, H),
            compiler_params=_CPARAMS,
        )(h, agg,
          params["conv_w1"][layer].astype(bf16), params["conv_b1"][layer],
          params["conv_w2"][layer].astype(bf16), params["conv_b2"][layer])

    # ---- dynamic coefficients + basis mixing (tiled over edges)
    h_row = h[row_g]
    h_col = h[col_g]
    mix = pl.pallas_call(
        dyn_mix_kernel,
        out_shape=jax.ShapeDtypeStruct((E_pad, 3), f32),
        grid=(n_et,),
        in_specs=[_row_spec(TE, H), _row_spec(TE, H), _row_spec(TE, H),
                  _row_spec(TE, 16),
                  _const_spec((H, HC)), _const_spec((H, HC)), _const_spec((1, HC)),
                  _const_spec((HC, 3)), _const_spec((1, 3))],
        out_specs=_row_spec(TE, 3),
        compiler_params=_CPARAMS,
    )(h_row, h_col, edge_attr, basis,
      params["dyn_w1"][:H].astype(bf16), params["dyn_w1"][H:].astype(bf16),
      params["dyn_b1"],
      params["dyn_w2"].astype(bf16), params["dyn_b2"])

    # ---- scatter-add scores to nodes (sorted) + annealed DSM loss
    scores = jax.ops.segment_sum(mix[:E], row, num_segments=N,
                                 indices_are_sorted=True)         # [N, 3]
    d = scores - pos_noise
    sq = jnp.sum(d * d, axis=-1)                                  # [N]
    if anneal_power == 0:
        loss_node = sq
    else:
        loss_node = sq * (std_pos ** anneal_power)
    counts = jax.ops.segment_sum(jnp.ones((N,), f32), node2graph, num_segments=G)
    loss_graph = jax.ops.segment_sum(loss_node, node2graph, num_segments=G) / counts
    loss = jnp.mean(loss_graph)
    return {"position": loss}, scores


# ----------------------------------------------------------------------------
if __name__ == "__main__":
    emb_dim = 32
    hidden_dim = 32
    num_graphs = 2
    nodes_per_graph = 8
    N = num_graphs * nodes_per_graph

    key = jax.random.PRNGKey(0)
    k_param, k_x, k_pos, k_fwd = jax.random.split(key, 4)

    params = init_params(k_param, emb_dim, hidden_dim)

    node_2D_repr = jax.random.normal(k_x, (N, emb_dim)).astype(jnp.float32)
    positions = jax.random.normal(k_pos, (N, 3)).astype(jnp.float32)

    # deterministic ring edges within each graph (both directions), E = 32
    rows, cols = [], []
    for g in range(num_graphs):
        base = g * nodes_per_graph
        for i in range(nodes_per_graph):
            a = base + i
            b = base + (i + 1) % nodes_per_graph
            rows += [a, b]
            cols += [b, a]
    edge_index = jnp.array([rows, cols], dtype=jnp.int32)
    node2graph = jnp.repeat(jnp.arange(num_graphs, dtype=jnp.int32), nodes_per_graph)

    loss_dict, scores = sde_model_2d_to_3d_forward(
        params, node_2D_repr, positions, edge_index, node2graph, num_graphs,
        k_fwd, num_diffusion_timesteps=1000, sigma_min=0.1, sigma_max=1.0,
        anneal_power=2.0)

    jax.block_until_ready(loss_dict["position"])
    jax.block_until_ready(scores)
    print("KERNEL_OK")
</pallas_src>

<mosaic_0001>
module attributes {stable_mosaic.version = 11 : i64} {
  func.func @edge_linear1_kernel(%arg0: i32, %arg1: memref<1xi32, #tpu.memory_space<smem>>, %arg2: memref<32x64xf32, #tpu.memory_space<vmem>>, %arg3: memref<64x32xf32, #tpu.memory_space<vmem>>, %arg4: memref<1x32xf32, #tpu.memory_space<vmem>>, %arg5: memref<32x32xf32, #tpu.memory_space<vmem>>, %arg6: memref<8x32xf32, #tpu.memory_space<vmem>>) attributes {dimension_semantics = [#tpu.dimension_semantics<parallel>], iteration_bounds = array<i64: 1>, scalar_prefetch = 0 : i64, scratch_operands = 0 : i64, tpu.core_type = #tpu.core_type<tc>, window_params = [{transform_indices = @transform_0, window_bounds = array<i64: 1>}, {transform_indices = @transform_1, window_bounds = array<i64: 32, 64>}, {pipeline_mode = #tpu.pipeline_mode<synchronous>, transform_indices = @transform_2, window_bounds = array<i64: 64, 32>}, {pipeline_mode = #tpu.pipeline_mode<synchronous>, transform_indices = @transform_3, window_bounds = array<i64: 1, 32>}, {transform_indices = @transform_4, window_bounds = array<i64: 32, 32>}, {transform_indices = @transform_5, window_bounds = array<i64: 8, 32>}]} {
    %c0 = arith.constant 0 : index
    %c0_0 = arith.constant 0 : index
    %0 = vector.load %arg2[%c0, %c0_0] : memref<32x64xf32, #tpu.memory_space<vmem>>, vector<32x64xf32>
    %c0_1 = arith.constant 0 : index
    %c0_2 = arith.constant 0 : index
    %1 = vector.load %arg3[%c0_1, %c0_2] : memref<64x32xf32, #tpu.memory_space<vmem>>, vector<64x32xf32>
    %cst = arith.constant dense<0.000000e+00> : vector<32x32xf32>
    %2 = tpu.matmul %0, %1, %cst {dimension_numbers = #tpu.dot_dimension_numbers<[1], [0], [0], [1], [0, 0, 1, 1], [], []>} : vector<32x64xf32>, vector<64x32xf32>, vector<32x32xf32> -> vector<32x32xf32>
    %c0_3 = arith.constant 0 : index
    %c0_4 = arith.constant 0 : index
    %3 = vector.load %arg4[%c0_3, %c0_4] : memref<1x32xf32, #tpu.memory_space<vmem>>, vector<1x32xf32>
    %4 = vector.broadcast %3 : vector<1x32xf32> to vector<32x32xf32>
    %5 = arith.addf %2, %4 : vector<32x32xf32>
    %c0_5 = arith.constant 0 : index
    %c0_6 = arith.constant 0 : index
    %6 = vector.load %arg5[%c0_5, %c0_6] : memref<32x32xf32, #tpu.memory_space<vmem>>, vector<32x32xf32>
    tpu.vector_store %arg5[%c0_5, %c0_6], %5 {strides = array<i32>} : memref<32x32xf32, #tpu.memory_space<vmem>>, vector<32x32xf32>,
    %c32_i32 = arith.constant 32 : i32
    %7 = arith.muli %arg0, %c32_i32 : i32
    %8 = tpu.iota {dimensions = array<i32: 0>} : vector<32x1xi32>
    %9 = vector.broadcast %7 : i32 to vector<32x1xi32>
    %10 = arith.addi %9, %8 : vector<32x1xi32>
    %c0_7 = arith.constant 0 : index
    %11 = memref.load %arg1[%c0_7] : memref<1xi32, #tpu.memory_space<smem>>
    %12 = vector.broadcast %11 : i32 to vector<32x1xi32>
    %13 = arith.cmpi slt, %10, %12 : vector<32x1xi32>
    %14 = arith.extui %13 : vector<32x1xi1> to vector<32x1xi32>
    %15 = arith.sitofp %14 : vector<32x1xi32> to vector<32x1xf32>
    %16 = vector.broadcast %15 : vector<32x1xf32> to vector<32x32xf32>
    %17 = arith.mulf %5, %16 : vector<32x32xf32>
    %cst_8 = arith.constant dense<0.000000e+00> : vector<32xf32>
    %18 = vector.multi_reduction <add>, %17, %cst_8 [0] : vector<32x32xf32> to vector<32xf32>
    %19 = vector.shape_cast %18 : vector<32xf32> to vector<1x32xf32>
    %20 = arith.mulf %17, %5 : vector<32x32xf32>
    %cst_9 = arith.constant dense<0.000000e+00> : vector<32xf32>
    %21 = vector.multi_reduction <add>, %20, %cst_9 [0] : vector<32x32xf32> to vector<32xf32>
    %22 = vector.shape_cast %21 : vector<32xf32> to vector<1x32xf32>
    %cst_10 = arith.constant 0.000000e+00 : f32
    %23 = vector.broadcast %cst_10 : f32 to vector<6x32xf32>
    %24 = tpu.concatenate %19, %22, %23 in 0 : vector<1x32xf32>, vector<1x32xf32>, vector<6x32xf32> -> vector<8x32xf32>
    %c0_11 = arith.constant 0 : index
    %c0_12 = arith.constant 0 : index
    %25 = vector.load %arg6[%c0_11, %c0_12] : memref<8x32xf32, #tpu.memory_space<vmem>>, vector<8x32xf32>
    tpu.vector_store %arg6[%c0_11, %c0_12], %24 {strides = array<i32>} : memref<8x32xf32, #tpu.memory_space<vmem>>, vector<8x32xf32>,
    return
  }
  func.func @transform_0(%arg0: i32) -> i32 {
    %c0_i32 = arith.constant 0 : i32
    %c0_i32_0 = arith.constant 0 : i32
    return %c0_i32 : i32
  }
  func.func @transform_1(%arg0: i32) -> (i32, i32) {
    %c0_i32 = arith.constant 0 : i32
    %c0_i32_0 = arith.constant 0 : i32
    return %arg0, %c0_i32 : i32, i32
  }
  func.func @transform_2(%arg0: i32) -> (i32, i32) {
    %c0_i32 = arith.constant 0 : i32
    %c0_i32_0 = arith.constant 0 : i32
    %c0_i32_1 = arith.constant 0 : i32
    return %c0_i32, %c0_i32_0 : i32, i32
  }
  func.func @transform_3(%arg0: i32) -> (i32, i32) {
    %c0_i32 = arith.constant 0 : i32
    %c0_i32_0 = arith.constant 0 : i32
    %c0_i32_1 = arith.constant 0 : i32
    return %c0_i32, %c0_i32_0 : i32, i32
  }
  func.func @transform_4(%arg0: i32) -> (i32, i32) {
    %c0_i32 = arith.constant 0 : i32
    %c0_i32_0 = arith.constant 0 : i32
    return %arg0, %c0_i32 : i32, i32
  }
  func.func @transform_5(%arg0: i32) -> (i32, i32) {
    %c0_i32 = arith.constant 0 : i32
    %c0_i32_0 = arith.constant 0 : i32
    return %arg0, %c0_i32 : i32, i32
  }
}

</mosaic_0001>

<bundles_post_ra>
// kernel: tpu_custom_call.1
= control target key start
LH: loop header
LB: loop body
LE: loop exit
PB: predicated region body
PF: predicated region fallthrough
CT: control target
= control target key end

     0   :  { %12 = vsyncpa [#allocation4], 0  ;;  %vm41_vm0 = vcmask 523264   ;;  %s476_s0 = inlined_call_operand.<no memory space> [shape: s32[1], index: 0, kind: input, shape index: {}]   ;;  %s477_s1 = inlined_call_operand.vmem [shape: f32[32,64], index: 1, kind: input, shape index: {}]   ;;  %s478_s2 = inlined_call_operand.vmem [shape: f32[64,32], index: 2, kind: input, shape index: {}]   ;;  %s479_s3 = inlined_call_operand.vmem [shape: f32[1,32], index: 3, kind: input, shape index: {}]   ;;  %s480_s4 = inlined_call_operand.hbm [shape: f32[32,32], index: 4, kind: output, shape index: {0}]   ;;  %s481_s5 = inlined_call_operand.hbm [shape: f32[8,32], index: 5, kind: output, shape index: {1}]  }
   0x1   :  { %v26_v0 = vld [vmem:[%s478_s2] sm:$0xff]  ;;  %v27_v1 = vld [vmem:[%s478_s2 + $0x8] sm:$0xff]  ;;  %v28_v2 = vld [vmem:[%s478_s2 + $0x10] sm:$0xff] }
   0x2   :  { %v281_v3 = vpack.c.bf16 %v27_v1, %v26_v0  ;;  %v29_v4 = vld [vmem:[%s478_s2 + $0x18] sm:$0xff]  ;;  %v30_v6 = vld [vmem:[%s478_s2 + $0x20] sm:$0xff]  ;;  %v31_v7 = vld [vmem:[%s478_s2 + $0x28] sm:$0xff] }
   0x3   :  { %v285_v5 = vpack.c.bf16 %v29_v4, %v28_v2  ;;  %v22_v8 = vld [vmem:[%s477_s1] sm:$0xff]  ;;  %v24_v9 = vld [vmem:[%s477_s1 + $0x10] sm:$0xff] }
   0x4   :  { %282 = vmatprep.subr.bf16.mxu0 %v281_v3  ;;  %297 = vmatprep.subr.bf16.mxu1 %v281_v3 }
   0x5   :  { %284 = vmatpush3.bf16.msra.mxu0 %v281_v3  ;;  %301 = vmatpush3.bf16.msra.mxu1 %v281_v3 }
   0x6   :  { %13 = vsyncpa [#allocation6], 0  ;;  %286 = vmatprep.subr.bf16.mxu0 %v285_v5  ;;  %298 = vmatprep.subr.bf16.mxu1 %v285_v5  ;;  %v289_v10 = vpack.c.bf16 %v31_v7, %v30_v6  ;;  %v32_v11 = vld [vmem:[%s478_s2 + $0x30] sm:$0xff]  ;;  %v33_v12 = vld [vmem:[%s478_s2 + $0x38] sm:$0xff]  ;;  %v145_v16 = vlaneseq  ;;  %v156_v20 = vstv %s476_s0  ;;  %vm139_vm5 = vcmask 261120  }
   0x7   :  { %275 = vmatprep.mubr.msk.f32.mxu0 %vm41_vm0, %v22_v8  ;;  %278 = vmatprep.mubr.msk.f32.mxu1 %vm41_vm0, %v24_v9  ;;  %v293_v13 = vpack.c.bf16 %v33_v12, %v32_v11  ;;  %v23_v14 = vld [vmem:[%s477_s1 + $0x8] sm:$0xff]  ;;  %v25_v15 = vld [vmem:[%s477_s1 + $0x18] sm:$0xff]  ;;  %v238_v22 = vld [vmem:[%s479_s3] ss:$0 sm:$0xff]  ;;  %s358_s1 = smov [#allocation3]   ;;  %v359_v24 = vmov 0.0  }
   0x8   :  { %v146_v17 = vshrl.u32 %v145_v16, 7  ;;  %s213_s20 = sshll.u32 %s358_s1, 4  ;;  %s214_s20 = int_to_ptr.vmem [resolvable:$true] %s213_s20 }
   0x9   :  { %288 = vmatpush3.bf16.msra.mxu0 %v285_v5  ;;  %302 = vmatpush3.bf16.msra.mxu1 %v285_v5  ;;  %s310_s0 = scalar_lea.vmem %s214_s20, 512  ;;  %p315_p1 = scmp.lt.s32.totalorder %s214_s20, %s214_s20 }
   0xa   :  { %290 = vmatprep.subr.bf16.mxu0 %v289_v10  ;;  %299 = vmatprep.subr.bf16.mxu1 %v289_v10  ;;  %v147_v18 = vadd.s32 8, %v146_v17  ;;  %v149_v19 = vadd.s32 24, %v146_v17  ;;  %v148_v21 = vadd.s32 16, %v146_v17  ;;  %vm157_vm3 = vcmp.lt.s32.totalorder %v146_v17, %v156_v20  ;;  %p311_p0 = scmp.ne.s32.totalorder %s214_s20, %s310_s0  ;;  %p316_p2 = scmp.lt.s32.totalorder %s310_s0, %s310_s0 }
   0xb   :  { %v243_v31 = vsel %vm157_vm3, 1.0, %v359_v24 }
   0xc   :  { %vm158_vm1 = vcmp.lt.s32.totalorder %v147_v18, %v156_v20  ;;  %vm160_vm2 = vcmp.lt.s32.totalorder %v149_v19, %v156_v20  ;;  %vm159_vm4 = vcmp.lt.s32.totalorder %v148_v21, %v156_v20  ;;  %p317_p3 = por %p316_p2, %p315_p1 }
   0xd   :  { %292 = vmatpush3.bf16.msra.mxu0 %v289_v10  ;;  %303 = vmatpush3.bf16.msra.mxu1 %v289_v10  ;;  %v244_v25 = vsel %vm158_vm1, 1.0, %v359_v24  ;;  %v246_v27 = vsel %vm160_vm2, 1.0, %v359_v24  ;;  %v245_v33 = vsel %vm159_vm4, 1.0, %v359_v24 }
   0xe   :  { %294 = vmatprep.subr.bf16.mxu0 %v293_v13  ;;  %300 = vmatprep.subr.bf16.mxu1 %v293_v13  ;;  %p318_p4 = pnand %p317_p3, %p311_p0 }
  0x11   :  { %296 = vmatpush3.bf16.msra.mxu0 %v293_v13  ;;  %304 = vmatpush3.bf16.msra.mxu1 %v293_v13 }
  0x14   :  { %276 = vmatmul.mubr.msk.f32.vlgmr.msra.gmra.mrb[0].mxu0 %vm41_vm0, %v23_v14  ;;  %279 = vmatmul.mubr.msk.f32.vlgmr.msra.gmra.mrb[0].mxu1 %vm41_vm0, %v25_v15 }
  0xe7   :  { %v277_v23 = vpop.f32.mrb[0].mxu0  ;;  %v280_v26 = vpop.f32.mrb[0].mxu1 }
  0xe8   :  { %v126_v28 = vadd.f32 %v277_v23, %v238_v22  ;;  %v136_v29 = vadd.f32 %v280_v26, %v238_v22  ;;  %v120_v30 = vpop.f32.mrb[1].mxu0  ;;  %v130_v32 = vpop.f32.mrb[1].mxu1 }
  0xe9   :  { %v121_v34 = vadd.f32 %v238_v22, %v120_v30  ;;  %v131_v35 = vadd.f32 %v238_v22, %v130_v32 }
  0xea   :  { %141 = vst.msk [vmem:[#allocation3 + $0x8] sm:$0xff] %vm139_vm5, %v126_v28  ;;  %v170_v36 = vmul.f32 %v244_v25, %v126_v28  ;;  %143 = vst.msk [vmem:[#allocation3 + $0x18] sm:$0xff] %vm139_vm5, %v136_v29  ;;  %v172_v37 = vmul.f32 %v246_v27, %v136_v29 }
  0xeb   :  { %140 = vst.msk [vmem:[#allocation3] sm:$0xff] %vm139_vm5, %v121_v34  ;;  %v169_v38 = vmul.f32 %v243_v31, %v121_v34  ;;  %142 = vst.msk [vmem:[#allocation3 + $0x10] sm:$0xff] %vm139_vm5, %v131_v35  ;;  %v171_v39 = vmul.f32 %v245_v33, %v131_v35 }
  0xec   :  { %v174_v40 = vsel %vm139_vm5, %v170_v36, 0.0  ;;  %v187_v41 = vmul.f32 %v170_v36, %v126_v28 }
  0xed   :  { %321 = shalt.err (!%p318_p4)
}
  0xee   :  { %s322_s22 = scalar_lea.hbm %s480_s4, 512 }
  0xef   :  { %p323_p5 = scmp.ne.s32.totalorder %s480_s4, %s322_s22  ;;  %p326_p6 = scmp.lt.u32.totalorder %s322_s22, %s480_s4 }
  0xf1   :  { %p328_p7 = pnand %p326_p6, %p323_p5 }
  0xf3   :  { %331 = shalt.err (!%p328_p7)
}
  0xf4   :  { %s360_s27 = smov 128   ;;  %s361_s28 = smov 8   ;;  %v173_v42 = vsel %vm139_vm5, %v169_v38, 0.0  ;;  %v186_v43 = vmul.f32 %v169_v38, %v121_v34  ;;  %v176_v44 = vsel %vm139_vm5, %v171_v39, 0.0  ;;  %v188_v45 = vmul.f32 %v171_v39, %v131_v35 }
  0xf5   :  { %219 = dma.vmem_to_hbm [thread:$0]  %s214_s20, 512, %s480_s4, [#allocation4], %s360_s27, %s360_s27, %s361_s28   ;;  %v191_v46 = vsel %vm139_vm5, %v187_v41, 0.0  ;;  %v175_v47 = vadd.f32 %v174_v40, %v173_v42  ;;  %v189_v48 = vmul.f32 %v172_v37, %v136_v29  ;;  %v178_v52 = vsel %vm139_vm5, %v172_v37, 0.0 }
  0xf6   :  { %v190_v49 = vsel %vm139_vm5, %v186_v43, 0.0  ;;  %v193_v53 = vsel %vm139_vm5, %v188_v45, 0.0  ;;  %vm203_vm6 = vcmask 1040384   ;;  %s362_s4 = smov [#allocation5]   ;;  %vm205_vm7 = vcmask 1041408  }
  0xf7   :  { %v192_v50 = vadd.f32 %v191_v46, %v190_v49  ;;  %v177_v51 = vadd.f32 %v176_v44, %v175_v47  ;;  %v195_v56 = vsel %vm139_vm5, %v189_v48, 0.0  ;;  %s226_s6 = sshll.u32 %s362_s4, 4  ;;  %s227_s6 = int_to_ptr.vmem [resolvable:$true] %s226_s6 }
  0xf8   :  { %s332_s7 = scalar_lea.vmem %s227_s6, 128  ;;  %p337_p9 = scmp.lt.s32.totalorder %s227_s6, %s227_s6 }
  0xf9   :  { %v179_v54 = vadd.f32 %v178_v52, %v177_v51  ;;  %v194_v55 = vadd.f32 %v193_v53, %v192_v50  ;;  %p333_p8 = scmp.ne.s32.totalorder %s227_s6, %s332_s7  ;;  %p338_p10 = scmp.lt.s32.totalorder %s332_s7, %s332_s7 }
  0xfb   :  { %v180_v57 = vrot.slane %v179_v54, 4  ;;  %v196_v58 = vadd.f32 %v195_v56, %v194_v55  ;;  %p339_p11 = por %p338_p10, %p337_p9 }
  0xfd   :  { %v181_v59 = vadd.f32 %v180_v57, %v179_v54  ;;  %v197_v60 = vrot.slane %v196_v58, 4  ;;  %p340_p12 = pnand %p339_p11, %p333_p8 }
  0xff   :  { %v198_v61 = vadd.f32 %v197_v60, %v196_v58  ;;  %v182_v62 = vrot.slane %v181_v59, 2 }
 0x101   :  { %v183_v63 = vadd.f32 %v182_v62, %v181_v59  ;;  %v199_v0 = vrot.slane %v198_v61, 2 }
 0x103   :  { %v184_v1 = vrot.slane %v183_v63, 1  ;;  %v200_v2 = vadd.f32 %v199_v0, %v198_v61 }
 0x105   :  { %v201_v3 = vrot.slane %v200_v2, 1  ;;  %v185_v4 = vadd.f32 %v184_v1, %v183_v63 }
 0x107   :  { %v202_v5 = vadd.f32 %v201_v3, %v200_v2 }
 0x109   :  { %v204_v6 = vsel %vm203_vm6, %v185_v4, %v202_v5 }
 0x10a   :  { %v206_v7 = vsel %vm205_vm7, %v204_v6, 0.0 }
 0x10b   :  { %207 = vst.msk [vmem:[#allocation5] sm:$0xff] %vm139_vm5, %v206_v7 }
 0x10c   :  { %343 = shalt.err (!%p340_p12)
}
 0x10d   :  { %s344_s10 = scalar_lea.hbm %s481_s5, 128 }
 0x10e   :  { %p345_p13 = scmp.ne.s32.totalorder %s481_s5, %s344_s10  ;;  %p348_p0 = scmp.lt.u32.totalorder %s344_s10, %s481_s5 }
 0x110   :  { %p350_p1 = pnand %p348_p0, %p345_p13 }
 0x112   :  { %353 = shalt.err (!%p350_p1)
}
 0x113   :  { %229 = dma.vmem_to_hbm [thread:$0]  %s227_s6, 128, %s481_s5, [#allocation6]  }
 0x114   :  { %354 = dma.done.wait [#allocation4], 512  }
 0x115   :  { %355 = vsyncadd [#allocation4], 4294966784 }
 0x116   :  { %356 = dma.done.wait [#allocation6], 128  }
 0x117   :  { %357 = vsyncadd [#allocation6], 4294967168 }
 0x118   :  { %236 = vsyncpa [#allocation4], 1 }
 0x119   :  { %237 = vsyncpa [#allocation6], 1 }

</bundles_post_ra>
